<compile_context>
chip_gen: v5e
topology: v5e:2x2
jax: 0.10.0
libtpu: 0.0.40
codegen_flags: <defaults>
</compile_context>

<pallas_src>
import functools
import math

import jax
import jax.numpy as jnp
from jax.experimental import pallas as pl
from jax.experimental.pallas import tpu as pltpu


def _round_up(x, m):
    return (x + m - 1) // m * m


# --------------------------------------------------------------------------
# Divisor-aware tile selection
# --------------------------------------------------------------------------
_TK_CAP = 4608                      # max K tile
_TILE_BYTES = 6 * 1024 * 1024       # max bf16 weight-tile bytes (fits v7x too)


def _choose_n(n):
    """Returns (Np, tn). Np always == n (never pad N)."""
    if n > 1024 and n % 640 == 0:
        return n, 640               # >=2 parallel N blocks for the big layers
    return n, n                     # single block == full dim (no constraint)


def _choose_k(k, tn):
    """Returns (Kp, tk): prefer whole-K, else a mult-of-128 divisor, else
    minimal padding.  Weight tile bytes stay under _TILE_BYTES."""
    cap = min(_TK_CAP, max(512, (_TILE_BYTES // (2 * tn)) // 128 * 128))
    if k <= cap or k * tn * 2 <= _TILE_BYTES:
        return k, k                 # one K step, zero padding
    t = cap // 128 * 128
    while t >= 128:                 # largest mult-of-128 divisor of k
        if k % t == 0:
            return k, t
        t -= 128
    best = None                     # fall back: minimal padding
    t = cap // 128 * 128
    while t >= 256:
        kp = _round_up(k, t)
        cost = (kp - k) * 4 + (kp // t) * 256
        if best is None or cost < best[0]:
            best = (cost, kp, t)
        t -= 128
    return best[1], best[2]


# --------------------------------------------------------------------------
# Matmul kernel: bf16 operands, f32 accumulation directly in the output
# block (resident across the K axis), fused bias (+SiLU) epilogue.
# --------------------------------------------------------------------------
def _matmul_kernel(a_ref, b_ref, bias_ref, o_ref, *, act):
    kk = pl.program_id(1)
    prod = jnp.dot(a_ref[...].astype(jnp.bfloat16), b_ref[...],
                   preferred_element_type=jnp.float32)

    @pl.when(kk == 0)
    def _first():
        o_ref[...] = prod

    @pl.when(kk > 0)
    def _acc():
        o_ref[...] = o_ref[...] + prod

    @pl.when(kk == pl.num_programs(1) - 1)
    def _epilogue():
        r = o_ref[...] + bias_ref[...]
        if act == "silu":
            r = r * jax.nn.sigmoid(r)
        o_ref[...] = r


def _matmul_impl(a, w, b, *, tk, tn, act):
    """a: (M, K), w: (Kp, Np) bf16 pre-padded, b: (1, Np) f32."""
    m, k = a.shape
    kp, np_ = w.shape
    if kp != k:                              # only the rare padded-K shapes
        a = jnp.pad(a, ((0, 0), (0, kp - k)))
    out = pl.pallas_call(
        functools.partial(_matmul_kernel, act=act),
        out_shape=jax.ShapeDtypeStruct((m, np_), jnp.float32),
        grid_spec=pltpu.PrefetchScalarGridSpec(
            num_scalar_prefetch=0,
            grid=(np_ // tn, kp // tk),
            in_specs=[
                pl.BlockSpec((m, tk), lambda j, kk: (0, kk)),
                pl.BlockSpec((tk, tn), lambda j, kk: (kk, j)),
                pl.BlockSpec((1, tn), lambda j, kk: (0, j)),
            ],
            out_specs=pl.BlockSpec((m, tn), lambda j, kk: (0, j)),
        ),
        compiler_params=pltpu.CompilerParams(
            dimension_semantics=("parallel", "arbitrary"),
            vmem_limit_bytes=32 * 1024 * 1024),
    )(a, w, b)
    return out


pallas_matmul = jax.jit(_matmul_impl, static_argnames=("tk", "tn", "act"))


# --------------------------------------------------------------------------
# Fused GroupNorm (+ optional SiLU): one grid step per batch element.
# --------------------------------------------------------------------------
def _groupnorm_kernel(x_ref, g_ref, b_ref, o_ref, *, eps, act, inv_count):
    x = x_ref[0]                                      # (32, gs, hw)
    s = jnp.sum(x, axis=2, keepdims=True)
    s = jnp.sum(s, axis=1, keepdims=True)             # (32, 1, 1)
    m = s * inv_count
    d = x - m
    v = jnp.sum(d * d, axis=2, keepdims=True)
    v = jnp.sum(v, axis=1, keepdims=True) * inv_count
    y = d * jax.lax.rsqrt(v + eps)
    y = y * g_ref[...] + b_ref[...]                   # (32, gs, 1) broadcast
    if act == "silu":
        y = y * jax.nn.sigmoid(y)
    o_ref[0] = y


def _group_norm_impl(x, g, b, *, eps, act):
    n, c, h, w = x.shape
    gs = c // 32
    hw = h * w
    xg = x.reshape(n, 32, gs, hw)
    out = pl.pallas_call(
        functools.partial(_groupnorm_kernel, eps=eps, act=act,
                          inv_count=1.0 / (gs * hw)),
        out_shape=jax.ShapeDtypeStruct((n, 32, gs, hw), jnp.float32),
        grid_spec=pltpu.PrefetchScalarGridSpec(
            num_scalar_prefetch=0,
            grid=(n,),
            in_specs=[
                pl.BlockSpec((1, 32, gs, hw), lambda i: (i, 0, 0, 0)),
                pl.BlockSpec((32, gs, 1), lambda i: (0, 0, 0)),
                pl.BlockSpec((32, gs, 1), lambda i: (0, 0, 0)),
            ],
            out_specs=pl.BlockSpec((1, 32, gs, hw), lambda i: (i, 0, 0, 0)),
        ),
        compiler_params=pltpu.CompilerParams(
            dimension_semantics=("parallel",)),
    )(xg, g, b)
    return out.reshape(n, c, h, w)


group_norm = jax.jit(_group_norm_impl, static_argnames=("eps", "act"))


# --------------------------------------------------------------------------
# LayerNorm (single grid step; arrays are tiny at this latent size).
# TODO(synk): could be fused into the following projection's prologue.
# --------------------------------------------------------------------------
def _layernorm_kernel(x_ref, g_ref, b_ref, o_ref, *, eps):
    x = x_ref[...]
    mean = jnp.mean(x, axis=-1, keepdims=True)
    var = jnp.mean(jnp.square(x - mean), axis=-1, keepdims=True)
    o_ref[...] = (x - mean) * jax.lax.rsqrt(var + eps) * g_ref[...] + b_ref[...]


def _layer_norm_impl(x, g, b, *, eps):
    shape = x.shape
    c = shape[-1]
    r = int(math.prod(shape[:-1]))
    out = pl.pallas_call(
        functools.partial(_layernorm_kernel, eps=eps),
        out_shape=jax.ShapeDtypeStruct((r, c), jnp.float32),
    )(x.reshape(r, c), g, b)
    return out.reshape(shape)


layer_norm = jax.jit(_layer_norm_impl, static_argnames=("eps",))


# --------------------------------------------------------------------------
# Fused attention: all (batch*heads) processed in ONE grid step.
# --------------------------------------------------------------------------
def _attention_kernel(q_ref, k_ref, v_ref, o_ref, *, scale):
    q = q_ref[...]                                    # (H, Sq, dh) bf16
    k = k_ref[...]
    v = v_ref[...]
    s = jnp.einsum('hqd,hkd->hqk', q, k,
                   preferred_element_type=jnp.float32) * scale
    s = s - jnp.max(s, axis=-1, keepdims=True)
    p = jnp.exp(s)
    denom = jnp.sum(p, axis=-1, keepdims=True)
    p = p * pl.reciprocal(denom, approx=True)
    o_ref[...] = jnp.einsum('hqk,hkd->hqd', p.astype(v.dtype), v,
                            preferred_element_type=jnp.float32)


def _mha_impl(q, k, v, *, n_heads):
    b, sq, d = q.shape
    skv = k.shape[1]
    dh = d // n_heads

    def split_heads(t, s):
        return (t.astype(jnp.bfloat16)
                .reshape(b, s, n_heads, dh)
                .transpose(0, 2, 1, 3)
                .reshape(b * n_heads, s, dh))

    qh, kh, vh = split_heads(q, sq), split_heads(k, skv), split_heads(v, skv)
    out = pl.pallas_call(
        functools.partial(_attention_kernel, scale=1.0 / math.sqrt(dh)),
        out_shape=jax.ShapeDtypeStruct((b * n_heads, sq, dh), jnp.float32),
    )(qh, kh, vh)
    return out.reshape(b, n_heads, sq, dh).transpose(0, 2, 1, 3).reshape(b, sq, d)


multi_head_attention = jax.jit(_mha_impl, static_argnames=("n_heads",))


# --------------------------------------------------------------------------
# GEGLU: x * gelu(gate)   (exact-erf GELU via Abramowitz&Stegun 7.1.26)
# --------------------------------------------------------------------------
def _gelu_exact(x):
    z = x * (1.0 / math.sqrt(2.0))
    az = jnp.abs(z)
    t = 1.0 / (1.0 + 0.3275911 * az)
    poly = ((((1.061405429 * t - 1.453152027) * t + 1.421413741) * t
             - 0.284496736) * t + 0.254829592) * t
    erf_abs = 1.0 - poly * jnp.exp(-az * az)
    erf_z = jnp.where(z >= 0, erf_abs, -erf_abs)
    return 0.5 * x * (1.0 + erf_z)


def _geglu_kernel(xg_ref, o_ref, *, half):
    x = xg_ref[:, :half]
    gate = xg_ref[:, half:]
    o_ref[...] = x * _gelu_exact(gate)


def _geglu_impl(xg):
    r, d2 = xg.shape
    dh = d2 // 2
    return pl.pallas_call(
        functools.partial(_geglu_kernel, half=dh),
        out_shape=jax.ShapeDtypeStruct((r, dh), jnp.float32),
    )(xg)


geglu = jax.jit(_geglu_impl)


# --------------------------------------------------------------------------
# Convolution (im2col in bf16 + Pallas matmul), jitted per shape.
# TODO(synk): at large latent resolutions the 9-tap window should be folded
# into the matmul grid instead of materializing im2col patches in HBM.
# --------------------------------------------------------------------------
def _conv2d_impl(x, w, b, *, k, stride, tk, tn):
    n, cin, h, wd = x.shape
    n_out = w.shape[1]
    x = x.astype(jnp.bfloat16)
    if k == 1 and stride == 1:
        xr = x.transpose(0, 2, 3, 1).reshape(n * h * wd, cin)
        out = _matmul_impl(xr, w, b, tk=tk, tn=tn, act="none")
        return out.reshape(n, h, wd, n_out).transpose(0, 3, 1, 2)
    pad = (k - 1) // 2
    xp = jnp.pad(x, ((0, 0), (0, 0), (pad, pad), (pad, pad)))
    ho = (h + 2 * pad - k) // stride + 1
    wo = (wd + 2 * pad - k) // stride + 1
    cols = []
    for ky in range(k):
        for kx in range(k):
            cols.append(xp[:, :, ky:ky + stride * ho:stride,
                           kx:kx + stride * wo:stride])
    patches = jnp.stack(cols, axis=2)                 # (N, Cin, 9, Ho, Wo)
    patches = patches.transpose(0, 3, 4, 1, 2).reshape(n * ho * wo, cin * k * k)
    out = _matmul_impl(patches, w, b, tk=tk, tn=tn, act="none")
    return out.reshape(n, ho, wo, n_out).transpose(0, 3, 1, 2)


conv2d = jax.jit(_conv2d_impl, static_argnames=("k", "stride", "tk", "tn"))


def conv_apply(p, x, stride=1):
    return conv2d(x, p['w'], p['b'], k=p['k'], stride=stride,
                  tk=p['tk'], tn=p['tn'])


def apply_linear(p, x, act="none"):
    shape = x.shape
    x2 = x.reshape(-1, shape[-1])
    out = pallas_matmul(x2, p['w'], p['b'], tk=p['tk'], tn=p['tn'], act=act)
    if out.shape[1] != p['N']:
        out = out[:, :p['N']]
    return out.reshape(shape[:-1] + (p['N'],))


def upsample_nearest2x(x):
    return jnp.repeat(jnp.repeat(x, 2, axis=2), 2, axis=3)


# --------------------------------------------------------------------------
# Deterministic, cheap parameter synthesis
# --------------------------------------------------------------------------
_W_SCALE = 0.02
_SALT = [0]


def _det_array(shape, scale, dtype):
    _SALT[0] += 1
    n = int(math.prod(shape))
    idx = jnp.arange(n, dtype=jnp.float32)
    vals = jnp.sin(idx * 0.12345 + float(_SALT[0]) * 0.7) * scale
    return vals.astype(dtype).reshape(shape)


def init_linear(in_f, out_f, bias=True):
    np_, tn = _choose_n(out_f)
    kp, tk = _choose_k(in_f, tn)
    w = _det_array((in_f, out_f), _W_SCALE, jnp.bfloat16)
    if kp != in_f or np_ != out_f:
        # pad region is zero -> safe even if A's K pad were nonzero
        w = jnp.pad(w, ((0, kp - in_f), (0, np_ - out_f)))
    if bias:
        b = _det_array((1, np_), _W_SCALE, jnp.float32)
    else:
        b = jnp.zeros((1, np_), jnp.float32)
    return {'w': w, 'b': b, 'K': in_f, 'N': out_f, 'tk': tk, 'tn': tn}


def init_conv(cin, cout, k):
    p = init_linear(cin * k * k, cout, bias=True)
    p['k'] = k
    return p


def init_groupnorm(c):
    g = c // 32
    return {'g': jnp.ones((32, g, 1), jnp.float32),
            'b': jnp.zeros((32, g, 1), jnp.float32)}


def init_layernorm(c):
    return {'g': jnp.ones((1, c), jnp.float32),
            'b': jnp.zeros((1, c), jnp.float32)}


def init_resblock(cin, cout, n_time=1280):
    return {
        'gn_f': init_groupnorm(cin),
        'conv_f': init_conv(cin, cout, 3),
        'lin_t': init_linear(n_time, cout),
        'gn_m': init_groupnorm(cout),
        'conv_m': init_conv(cout, cout, 3),
        'res': None if cin == cout else init_conv(cin, cout, 1),
    }


def init_attnblock(n_head, n_embd, d_ctx=768):
    ch = n_head * n_embd
    return {
        'n_head': n_head,
        'gn': init_groupnorm(ch),
        'conv_in': init_conv(ch, ch, 1),
        'ln1': init_layernorm(ch),
        'attn1_in': init_linear(ch, 3 * ch, bias=False),
        'attn1_out': init_linear(ch, ch),
        'ln2': init_layernorm(ch),
        'attn2_q': init_linear(ch, ch, bias=False),
        'attn2_kv': init_linear(d_ctx, 2 * ch, bias=False),   # fused K|V
        'attn2_out': init_linear(ch, ch),
        'ln3': init_layernorm(ch),
        'geglu1': init_linear(ch, 4 * ch * 2),
        'geglu2': init_linear(4 * ch, ch),
        'conv_out': init_conv(ch, ch, 1),
    }


def _conv_layer(cin, cout, k, stride=1):
    return {'kind': 'conv', 'p': init_conv(cin, cout, k), 'stride': stride}


def _res_layer(cin, cout):
    return {'kind': 'res', 'p': init_resblock(cin, cout)}


def _attn_layer(n_head, n_embd):
    return {'kind': 'attn', 'p': init_attnblock(n_head, n_embd)}


def _up_layer(ch):
    return {'kind': 'upsample', 'p': init_conv(ch, ch, 3)}


def init_unet():
    encoders = [
        [_conv_layer(4, 320, 3)],
        [_res_layer(320, 320), _attn_layer(8, 40)],
        [_res_layer(320, 320), _attn_layer(8, 40)],
        [_conv_layer(320, 320, 3, stride=2)],
        [_res_layer(320, 640), _attn_layer(8, 80)],
        [_res_layer(640, 640), _attn_layer(8, 80)],
        [_conv_layer(640, 640, 3, stride=2)],
        [_res_layer(640, 1280), _attn_layer(8, 160)],
        [_res_layer(1280, 1280), _attn_layer(8, 160)],
        [_conv_layer(1280, 1280, 3, stride=2)],
        [_res_layer(1280, 1280)],
        [_res_layer(1280, 1280)],
    ]
    bottleneck = [_res_layer(1280, 1280), _attn_layer(8, 160),
                  _res_layer(1280, 1280)]
    decoders = [
        [_res_layer(2560, 1280)],
        [_res_layer(2560, 1280)],
        [_res_layer(2560, 1280), _up_layer(1280)],
        [_res_layer(2560, 1280), _attn_layer(8, 160)],
        [_res_layer(2560, 1280), _attn_layer(8, 160)],
        [_res_layer(1920, 1280), _attn_layer(8, 160), _up_layer(1280)],
        [_res_layer(1920, 640), _attn_layer(8, 80)],
        [_res_layer(1280, 640), _attn_layer(8, 80)],
        [_res_layer(960, 640), _attn_layer(8, 80), _up_layer(640)],
        [_res_layer(960, 320), _attn_layer(8, 40)],
        [_res_layer(640, 320), _attn_layer(8, 40)],
        [_res_layer(640, 320), _attn_layer(8, 40)],
    ]
    return {'encoders': encoders, 'bottleneck': bottleneck, 'decoders': decoders}


def init_diffusion():
    return {
        'time_embedding': {'l1': init_linear(320, 1280),
                           'l2': init_linear(1280, 1280)},
        'unet': init_unet(),
        'final': {'gn': init_groupnorm(320), 'conv': init_conv(320, 4, 3)},
    }


# --------------------------------------------------------------------------
# Forward pass (mirrors the PyTorch module structure)
# --------------------------------------------------------------------------
def apply_time_embedding(p, t):
    # TimeEmbedding = linear2(silu(linear1(t))).  Every consumer of the
    # embedding (UNET_ResidualBlock.linear_time) applies silu first, so silu
    # is folded into the second linear's epilogue (valid only while resblocks
    # remain the sole consumers).
    h = apply_linear(p['l1'], t, act="silu")
    return apply_linear(p['l2'], h, act="silu")


def apply_resblock(p, feature, t_silu):
    residue = feature
    h = group_norm(feature, p['gn_f']['g'], p['gn_f']['b'], eps=1e-5, act="silu")
    h = conv_apply(p['conv_f'], h)
    tproj = apply_linear(p['lin_t'], t_silu)              # (1, cout)
    h = h + tproj[:, :, None, None]
    h = group_norm(h, p['gn_m']['g'], p['gn_m']['b'], eps=1e-5, act="silu")
    h = conv_apply(p['conv_m'], h)
    skip = residue if p['res'] is None else conv_apply(p['res'], residue)
    return h + skip


def apply_attnblock(p, x, context):
    # TODO(synk): the PyTorch block also stashes softmax weights into
    # attention_map_store (a side-effect dict); it does not affect the output.
    n_head = p['n_head']
    residue_long = x
    h = group_norm(x, p['gn']['g'], p['gn']['b'], eps=1e-6, act="none")
    h = conv_apply(p['conv_in'], h)
    n, c, hh, ww = h.shape
    h = h.reshape(n, c, hh * ww).transpose(0, 2, 1)        # (n, hw, c)

    res = h
    hn = layer_norm(h, p['ln1']['g'], p['ln1']['b'], eps=1e-5)
    qkv = apply_linear(p['attn1_in'], hn)
    q, k, v = jnp.split(qkv, 3, axis=-1)
    a = multi_head_attention(q, k, v, n_heads=n_head)
    h = apply_linear(p['attn1_out'], a) + res

    res = h
    hn = layer_norm(h, p['ln2']['g'], p['ln2']['b'], eps=1e-5)
    q = apply_linear(p['attn2_q'], hn)
    kv = apply_linear(p['attn2_kv'], context)              # fused K|V matmul
    kk, vv = jnp.split(kv, 2, axis=-1)
    a = multi_head_attention(q, kk, vv, n_heads=n_head)
    h = apply_linear(p['attn2_out'], a) + res

    res = h
    hn = layer_norm(h, p['ln3']['g'], p['ln3']['b'], eps=1e-5)
    xg = apply_linear(p['geglu1'], hn)                     # (n, hw, 8c)
    g = geglu(xg.reshape(n * hh * ww, -1)).reshape(n, hh * ww, 4 * c)
    h = apply_linear(p['geglu2'], g) + res

    h = h.transpose(0, 2, 1).reshape(n, c, hh, ww)
    return conv_apply(p['conv_out'], h) + residue_long


def apply_layer(layer, x, context, t_silu):
    kind = layer['kind']
    if kind == 'conv':
        return conv_apply(layer['p'], x, stride=layer['stride'])
    if kind == 'res':
        return apply_resblock(layer['p'], x, t_silu)
    if kind == 'attn':
        return apply_attnblock(layer['p'], x, context)
    if kind == 'upsample':
        return conv_apply(layer['p'], upsample_nearest2x(x))
    raise ValueError(kind)


def apply_unet(p, x, context, t_silu):
    skips = []
    for stage in p['encoders']:
        for layer in stage:
            x = apply_layer(layer, x, context, t_silu)
        skips.append(x)
    for layer in p['bottleneck']:
        x = apply_layer(layer, x, context, t_silu)
    for stage in p['decoders']:
        x = jnp.concatenate([x, skips.pop()], axis=1)
        for layer in stage:
            x = apply_layer(layer, x, context, t_silu)
    return x


def diffusion_forward(params, latent, context, time):
    t_silu = apply_time_embedding(params['time_embedding'], time)
    x = apply_unet(params['unet'], latent, context, t_silu)
    x = group_norm(x, params['final']['gn']['g'], params['final']['gn']['b'],
                   eps=1e-5, act="silu")
    x = conv_apply(params['final']['conv'], x)
    return x


# --------------------------------------------------------------------------
if __name__ == "__main__":
    key = jax.random.PRNGKey(0)
    k1, k2, k3 = jax.random.split(key, 3)
    latent = jax.random.normal(k1, (1, 4, 8, 8), jnp.float32)      # NCHW
    context = jax.random.normal(k2, (1, 8, 768), jnp.float32)      # (B, seq, 768)
    time = jax.random.normal(k3, (1, 320), jnp.float32)            # (1, 320)

    params = init_diffusion()
    out = diffusion_forward(params, latent, context, time)
    out = jax.block_until_ready(out)

    assert out.shape == (1, 4, 8, 8), out.shape
    assert out.dtype == jnp.float32
    assert bool(jnp.all(jnp.isfinite(out)))
    print("KERNEL_OK")
</pallas_src>

<mosaic_0001>
module attributes {stable_mosaic.version = 11 : i64} {
  func.func @_matmul_kernel(%arg0: i32, %arg1: i32, %arg2: memref<1x320xf32, #tpu.memory_space<vmem>>, %arg3: memref<320x640xbf16, #tpu.memory_space<vmem>>, %arg4: memref<1x640xf32, #tpu.memory_space<vmem>>, %arg5: memref<1x640xf32, #tpu.memory_space<vmem>>) attributes {dimension_semantics = [#tpu.dimension_semantics<parallel>, #tpu.dimension_semantics<arbitrary>], iteration_bounds = array<i64: 2, 1>, scalar_prefetch = 0 : i64, scratch_operands = 0 : i64, tpu.core_type = #tpu.core_type<tc>, window_params = [{transform_indices = @transform_0, window_bounds = array<i64: 1, 320>}, {transform_indices = @transform_1, window_bounds = array<i64: 320, 640>}, {transform_indices = @transform_2, window_bounds = array<i64: 1, 640>}, {transform_indices = @transform_3, window_bounds = array<i64: 1, 640>}]} {
    %c0 = arith.constant 0 : index
    %c0_0 = arith.constant 0 : index
    %0 = vector.load %arg2[%c0, %c0_0] : memref<1x320xf32, #tpu.memory_space<vmem>>, vector<1x320xf32>
    %1 = arith.truncf %0 : vector<1x320xf32> to vector<1x320xbf16>
    %c0_1 = arith.constant 0 : index
    %c0_2 = arith.constant 0 : index
    %2 = vector.load %arg3[%c0_1, %c0_2] : memref<320x640xbf16, #tpu.memory_space<vmem>>, vector<320x640xbf16>
    %cst = arith.constant dense<0.000000e+00> : vector<1x640xf32>
    %3 = tpu.matmul %1, %2, %cst {dimension_numbers = #tpu.dot_dimension_numbers<[1], [0], [0], [1], [0, 0, 1, 1], [], []>} : vector<1x320xbf16>, vector<320x640xbf16>, vector<1x640xf32> -> vector<1x640xf32>
    %c0_i32 = arith.constant 0 : i32
    %4 = arith.cmpi eq, %arg1, %c0_i32 : i32
    %5 = arith.extui %4 : i1 to i32
    %c0_i32_3 = arith.constant 0 : i32
    %6 = arith.cmpi ne, %5, %c0_i32_3 : i32
    scf.if %6 {
      %c0_8 = arith.constant 0 : index
      %c0_9 = arith.constant 0 : index
      %13 = vector.load %arg5[%c0_8, %c0_9] : memref<1x640xf32, #tpu.memory_space<vmem>>, vector<1x640xf32>
      tpu.vector_store %arg5[%c0_8, %c0_9], %3 {strides = array<i32>} : memref<1x640xf32, #tpu.memory_space<vmem>>, vector<1x640xf32>,
    } else {
    }
    %c0_i32_4 = arith.constant 0 : i32
    %7 = arith.cmpi sgt, %arg1, %c0_i32_4 : i32
    %8 = arith.extui %7 : i1 to i32
    %c0_i32_5 = arith.constant 0 : i32
    %9 = arith.cmpi ne, %8, %c0_i32_5 : i32
    scf.if %9 {
      %c0_8 = arith.constant 0 : index
      %c0_9 = arith.constant 0 : index
      %13 = vector.load %arg5[%c0_8, %c0_9] : memref<1x640xf32, #tpu.memory_space<vmem>>, vector<1x640xf32>
      %14 = arith.addf %13, %3 : vector<1x640xf32>
      %c0_10 = arith.constant 0 : index
      %c0_11 = arith.constant 0 : index
      %15 = vector.load %arg5[%c0_10, %c0_11] : memref<1x640xf32, #tpu.memory_space<vmem>>, vector<1x640xf32>
      tpu.vector_store %arg5[%c0_10, %c0_11], %14 {strides = array<i32>} : memref<1x640xf32, #tpu.memory_space<vmem>>, vector<1x640xf32>,
    } else {
    }
    %c0_i32_6 = arith.constant 0 : i32
    %10 = arith.cmpi eq, %arg1, %c0_i32_6 : i32
    %11 = arith.extui %10 : i1 to i32
    %c0_i32_7 = arith.constant 0 : i32
    %12 = arith.cmpi ne, %11, %c0_i32_7 : i32
    scf.if %12 {
      %c0_8 = arith.constant 0 : index
      %c0_9 = arith.constant 0 : index
      %13 = vector.load %arg5[%c0_8, %c0_9] : memref<1x640xf32, #tpu.memory_space<vmem>>, vector<1x640xf32>
      %c0_10 = arith.constant 0 : index
      %c0_11 = arith.constant 0 : index
      %14 = vector.load %arg4[%c0_10, %c0_11] : memref<1x640xf32, #tpu.memory_space<vmem>>, vector<1x640xf32>
      %15 = arith.addf %13, %14 : vector<1x640xf32>
      %16 = arith.negf %15 : vector<1x640xf32>
      %17 = math.exp %16 : vector<1x640xf32>
      %cst_12 = arith.constant 1.000000e+00 : f32
      %18 = vector.broadcast %cst_12 : f32 to vector<1x640xf32>
      %19 = arith.addf %18, %17 : vector<1x640xf32>
      %20 = arith.divf %18, %19 : vector<1x640xf32>
      %21 = arith.mulf %15, %20 : vector<1x640xf32>
      %c0_13 = arith.constant 0 : index
      %c0_14 = arith.constant 0 : index
      %22 = vector.load %arg5[%c0_13, %c0_14] : memref<1x640xf32, #tpu.memory_space<vmem>>, vector<1x640xf32>
      tpu.vector_store %arg5[%c0_13, %c0_14], %21 {strides = array<i32>} : memref<1x640xf32, #tpu.memory_space<vmem>>, vector<1x640xf32>,
    } else {
    }
    return
  }
  func.func @transform_0(%arg0: i32, %arg1: i32) -> (i32, i32) {
    %c0_i32 = arith.constant 0 : i32
    %c0_i32_0 = arith.constant 0 : i32
    return %c0_i32, %arg1 : i32, i32
  }
  func.func @transform_1(%arg0: i32, %arg1: i32) -> (i32, i32) {
    %c0_i32 = arith.constant 0 : i32
    return %arg1, %arg0 : i32, i32
  }
  func.func @transform_2(%arg0: i32, %arg1: i32) -> (i32, i32) {
    %c0_i32 = arith.constant 0 : i32
    %c0_i32_0 = arith.constant 0 : i32
    return %c0_i32, %arg0 : i32, i32
  }
  func.func @transform_3(%arg0: i32, %arg1: i32) -> (i32, i32) {
    %c0_i32 = arith.constant 0 : i32
    %c0_i32_0 = arith.constant 0 : i32
    return %c0_i32, %arg0 : i32, i32
  }
}

</mosaic_0001>

<bundles_post_ra>
// kernel: _matmul_impl.1
= control target key start
LH: loop header
LB: loop body
LE: loop exit
PB: predicated region body
PF: predicated region fallthrough
CT: control target
= control target key end

     0   :  { %8 = vsyncpa [#allocation3], 0  ;;  %s2560_s0 = inlined_call_operand.hbm [shape: f32[1,320], index: 0, kind: input, shape index: {}]   ;;  %s2561_s1 = inlined_call_operand.hbm [shape: bf16[320,1280], index: 1, kind: input, shape index: {}]   ;;  %s2562_s2 = inlined_call_operand.hbm [shape: f32[1,1280], index: 2, kind: input, shape index: {}]   ;;  %s2563_s3 = inlined_call_operand.hbm [shape: f32[1,1280], index: 3, kind: output, shape index: {}]  }
   0x1   :  { %9 = vsyncpa [#allocation6], 0 }
   0x2   :  { %11 = vsyncpa [#allocation6 + $0x1], 0 }
   0x3   :  { %12 = vsyncpa [#allocation4], 0 }
   0x4   :  { %14 = vsyncpa [#allocation4 + $0x1], 0  ;;  %s2148_s12 = smov 0   ;;  %s2150_s13 = smov 0  }
   0x5   :  { %s2152_s14 = smov 0   ;;  %s2154_s15 = smov 0  }
   0x6   :  { %s2156_s16 = smov 0   ;;  %s2158_s17 = smov 0  }
   0x7 LB: > { %s32_s18 = sadd.s32 1, %s2118_s16  ;;  %s67_s19 = sadd.s32 1, %s2110_s14  ;;  %s2122_s17 = sphi %s2158_s17, %s20_s17   ;;  %s2118_s16 = sphi %s2156_s16, %s2575_s16   ;;  %s2114_s15 = sphi %s2154_s15, %s2574_s15   ;;  %s2110_s14 = sphi %s2152_s14, %s2573_s14   ;;  %s2106_s13 = sphi %s2150_s13, %s2572_s13   ;;  %s2102_s12 = sphi %s2148_s12, %s2571_s12  }
   0x8   : > { %p34_p0 = scmp.ge.s32.totalorder %s32_s18, 2  ;;  %p74_p1 = scmp.ne.s32.totalorder %s2110_s14, %s2106_s13 }
   0x9   : > { %p75_p2 = scmp.eq.s32.totalorder %s2122_s17, 0  ;;  %p1344_p3 = scmp.ge.s32.totalorder %s2122_s17, 2 }
   0xa   : > { %s2577_s18 = smov (%p34_p0, %s32_s18), 0  ;;  %p1887_p5 = scmp.lt.s32.totalorder %s2122_s17, 2 }
   0xb   : > { %p76_p4 = por %p75_p2, %p74_p1  ;;  %s63_s20 = ssub.s32 %s2118_s16, %s2577_s18 }
   0xc   : > { %s170_s21 = sand.u32 1, %s2122_s17   ;;  %p65_p6 = scmp.eq.s32.totalorder %s63_s20, 0 }
   0xd   : > { %s172_s22 = sand.u32 1, %s2110_s14   ;;  %s1756_s23 = smul.u32 20, %s2118_s16 }
   0xe   : > { %s2196_s24 = scalar_select %p65_p6, %s2110_s14, %s67_s19  }
   0xf   : > { %s1857_s25 = smul.u32 800, %s172_s22  ;;  %s182_s28 = scalar_lea.hbm %s2561_s1, %s1756_s23 }
  0x10   : > { %s183_s29 = sshll.u32 %s182_s28, 4  ;;  %p2203_p7 = pnand %p1887_p5, %p76_p4  ;;  %s184_s29 = int_to_ptr.hbm [resolvable:$true] %s183_s29 }
  0x11   : > { %s174_s4 = scalar_lea.vmem [#allocation5], %s1857_s25  ;;  %s2207_s6 = scalar_lea.sflag [#allocation6], %s170_s21 }
  0x12   : > { %s185_s5 = sshll.u32 %s174_s4, 4  ;;  %s2124_s7 = smov 640   ;;  %s186_s5 = int_to_ptr.vmem [resolvable:$true] %s185_s5 }
  0x13   : > { %s2125_s8 = smov 320   ;;  %s2126_s9 = smov 20  }
  0x14   : > { %1878 = dma.hbm_to_vmem [thread:$0]  (!%p2203_p7), %s184_s29, 12800, %s186_s5, %s2207_s6, %s2124_s7, %s2125_s8, %s2126_s9  }
  0x15   : > { %s2213_s10 = sadd.s32 4294967295, %s2122_s17   ;;  %s1341_s11 = sadd.s32 4294967294, %s2122_s17  }
  0x16   : > { %p80_p8 = scmp.ne.s32.totalorder %s2106_s13, %s2102_s12  ;;  %p81_p9 = scmp.eq.s32.totalorder %s2213_s10, 0 }
  0x17   : > { %p130_p10 = scmp.eq.s32.totalorder %s2213_s10, 1  ;;  %p136_p11 = scmp.eq.s32.totalorder %s1341_s11, 1 }
  0x18   : > { %p2222_p12 = por %p81_p9, %p80_p8  ;;  %p1342_p13 = scmp.ge.s32.totalorder %s2122_s17, 1 }
  0x19   : > { %p2230_p0 = por %p130_p10, %p74_p1  ;;  %p2234_p2 = por %p136_p11, %p80_p8 }
  0x1a   : > { %p143_p4 = scmp.lt.s32.totalorder %s2122_s17, 3  ;;  %s157_s26 = sshll.u32 %s2560_s0, 4  ;;  %s158_s26 = int_to_ptr.hbm [resolvable:$true] %s157_s26 }
  0x1b   : > { %s2127_s28 = smov [#allocation2]   ;;  %s1858_s4 = smul.u32 5, %s172_s22 }
  0x1c   : > { %p2242_p5 = pnand %p1342_p13, %p143_p4  ;;  %s159_s29 = sshll.u32 %s2127_s28, 4  ;;  %s160_s29 = int_to_ptr.vmem [resolvable:$true] %s159_s29 }
  0x1d   : > { %s200_s5 = smul.u32 5, %s2118_s16  ;;  %s199_s7 = scalar_lea.vmem [#allocation7], %s1858_s4 }
  0x1e   : > { %p1871_p1 = pneg %p2242_p5  ;;  %s207_s8 = sshll.u32 %s199_s7, 4  ;;  %s208_s8 = int_to_ptr.vmem [resolvable:$true] %s207_s8 }
  0x1f   : > { %s203_s23 = scalar_lea.hbm %s2562_s2, %s200_s5  ;;  %216 = sbr.rel (%p2242_p5) target bundleno = 334 (0x14e), region = 32 }
  0x20   : > { %p1872_p6 = pnand %p1871_p1, %p81_p9  ;;  %s205_s25 = sshll.u32 %s203_s23, 4  ;;  %s206_s25 = int_to_ptr.hbm [resolvable:$true] %s205_s25 }
  0x21   : > { %1881 = dma.hbm_to_vmem [thread:$0]  (!%p2203_p7), %s206_s25, 80, %s208_s8, %s2207_s6  }
  0x22   : > { %1874 = dma.hbm_to_vmem [thread:$0]  (!%p1872_p6), %s158_s26, 48, %s160_s29, [#allocation3]  }
  0x24   : > { %2089 = dma.done.wait (%p81_p9), [#allocation3], 48  }
  0x25   : > { %2091 = vsyncadd (%p81_p9), [#allocation3], 4294967248  ;;  %s223_s22 = sand.u32 1, %s2213_s10   ;;  %s2267_s28 = sand.u32 1, %s2106_s13  }
  0x26   : > { %s1859_s26 = smul.u32 800, %s2267_s28  ;;  %s224_s29 = scalar_lea.sflag [#allocation6], %s223_s22 }
  0x28   : > { %s2270_s30 = scalar_lea.vmem [#allocation5], %s1859_s26 }
  0x29   : > { %2093 = dma.done.wait (%p2222_p12), %s224_s29, 12880  }
  0x2a   : > { %2095 = vsyncadd (%p2222_p12), %s224_s29, 4294954416  ;;  %v1490_v0 = vld [vmem:[%s2270_s30 + $0x118] sm:$0xf]  ;;  %v1794_v1 = vld [vmem:[%s2270_s30 + $0x128] sm:$0xf0]  ;;  %vm923_vm0 = vcmask 523264  }
  0x2b   : > { %v1650_v2 = vld [vmem:[%s2270_s30 + $0x258] sm:$0xf]  ;;  %v1491_v3 = vor.u32 %v1794_v1, %v1490_v0  ;;  %v1834_v4 = vld [vmem:[%s2270_s30 + $0x268] sm:$0xf0]  ;;  %v1792_v5 = vld [vmem:[%s2270_s30 + $0x11c] sm:$0xf] }
  0x2c   : > { %v1492_v6 = vld [vmem:[%s2270_s30 + $0x12c] sm:$0xf0]  ;;  %v1651_v7 = vor.u32 %v1834_v4, %v1650_v2  ;;  %v1730_v9 = vld [vmem:[%s2270_s30 + $0x2f8] sm:$0xf]  ;;  %v1854_v10 = vld [vmem:[%s2270_s30 + $0x308] sm:$0xf0] }
  0x2d   : > { %v1495_v8 = vor.u32 %v1792_v5, %v1492_v6  ;;  %v1470_v11 = vld [vmem:[%s2270_s30 + $0xf0] sm:$0xf]  ;;  %927 = vmatpush.bf16.msra.mxu0 %v1491_v3  ;;  %v1731_v12 = vor.u32 %v1854_v10, %v1730_v9  ;;  %v1789_v13 = vld [vmem:[%s2270_s30 + $0x100] sm:$0xf0]  ;;  %v1787_v18 = vld [vmem:[%s2270_s30 + $0xf4] sm:$0xf] }
  0x2e   : > { %v1630_v14 = vld [vmem:[%s2270_s30 + $0x230] sm:$0xf]  ;;  %v1829_v15 = vld [vmem:[%s2270_s30 + $0x240] sm:$0xf0]  ;;  %940 = vmatpush.bf16.msra.mxu1 %v1651_v7  ;;  %v1471_v16 = vor.u32 %v1789_v13, %v1470_v11  ;;  %v1472_v19 = vld [vmem:[%s2270_s30 + $0x104] sm:$0xf0] }
  0x2f   : > { %966 = vmatpush.bf16.msra.mxu3 %v1495_v8  ;;  %v1631_v17 = vor.u32 %v1829_v15, %v1630_v14  ;;  %v1710_v20 = vld [vmem:[%s2270_s30 + $0x2d0] sm:$0xf]  ;;  %957 = vmatpush.bf16.msra.mxu2 %v1731_v12  ;;  %v1475_v21 = vor.u32 %v1787_v18, %v1472_v19  ;;  %v1849_v22 = vld [vmem:[%s2270_s30 + $0x2e0] sm:$0xf0]  ;;  %v1450_v23 = vld [vmem:[%s2270_s30 + $0xc8] sm:$0xf] }
  0x30   : > { %v1784_v24 = vld [vmem:[%s2270_s30 + $0xd8] sm:$0xf0]  ;;  %v1711_v25 = vor.u32 %v1849_v22, %v1710_v20  ;;  %v1610_v26 = vld [vmem:[%s2270_s30 + $0x208] sm:$0xf]  ;;  %v1782_v28 = vld [vmem:[%s2270_s30 + $0xcc] sm:$0xf] }
  0x31   : > { %v1824_v27 = vld [vmem:[%s2270_s30 + $0x218] sm:$0xf0]  ;;  %928 = vmatpush.bf16.msra.mxu0 %v1471_v16  ;;  %v1451_v29 = vor.u32 %v1784_v24, %v1450_v23  ;;  %v1452_v30 = vld [vmem:[%s2270_s30 + $0xdc] sm:$0xf0]  ;;  %v1690_v31 = vld [vmem:[%s2270_s30 + $0x2a8] sm:$0xf] }
  0x32   : > { %v1844_v32 = vld [vmem:[%s2270_s30 + $0x2b8] sm:$0xf0]  ;;  %941 = vmatpush.bf16.msra.mxu1 %v1631_v17  ;;  %v1611_v33 = vor.u32 %v1824_v27, %v1610_v26  ;;  %v1455_v34 = vor.u32 %v1782_v28, %v1452_v30  ;;  %v1430_v35 = vld [vmem:[%s2270_s30 + $0xa0] sm:$0xf]  ;;  %v1779_v36 = vld [vmem:[%s2270_s30 + $0xb0] sm:$0xf0] }
  0x33   : > { %967 = vmatpush.bf16.msra.mxu3 %v1475_v21  ;;  %v1590_v37 = vld [vmem:[%s2270_s30 + $0x1e0] sm:$0xf]  ;;  %958 = vmatpush.bf16.msra.mxu2 %v1711_v25  ;;  %v1691_v38 = vor.u32 %v1844_v32, %v1690_v31  ;;  %v1819_v39 = vld [vmem:[%s2270_s30 + $0x1f0] sm:$0xf0]  ;;  %v1777_v40 = vld [vmem:[%s2270_s30 + $0xa4] sm:$0xf]  ;;  %v1431_v44 = vor.u32 %v1779_v36, %v1430_v35 }
  0x34   : > { %v1432_v41 = vld [vmem:[%s2270_s30 + $0xb4] sm:$0xf0]  ;;  %v1670_v42 = vld [vmem:[%s2270_s30 + $0x280] sm:$0xf]  ;;  %v1839_v43 = vld [vmem:[%s2270_s30 + $0x290] sm:$0xf0]  ;;  %v1591_v47 = vor.u32 %v1819_v39, %v1590_v37 }
  0x35   : > { %929 = vmatpush.bf16.msra.mxu0 %v1451_v29  ;;  %v1832_v45 = vld [vmem:[%s2270_s30 + $0x25c] sm:$0xf]  ;;  %v1652_v46 = vld [vmem:[%s2270_s30 + $0x26c] sm:$0xf0]  ;;  %v1435_v48 = vor.u32 %v1777_v40, %v1432_v41  ;;  %v1410_v49 = vld [vmem:[%s2270_s30 + $0x78] sm:$0xf]  ;;  %v1671_v52 = vor.u32 %v1839_v43, %v1670_v42 }
  0x36   : > { %942 = vmatpush.bf16.msra.mxu1 %v1611_v33  ;;  %v1774_v50 = vld [vmem:[%s2270_s30 + $0x88] sm:$0xf0]  ;;  %v1570_v51 = vld [vmem:[%s2270_s30 + $0x1b8] sm:$0xf]  ;;  %v1772_v54 = vld [vmem:[%s2270_s30 + $0x7c] sm:$0xf]  ;;  %v1655_v56 = vor.u32 %v1832_v45, %v1652_v46 }
  0x37   : > { %968 = vmatpush.bf16.msra.mxu3 %v1455_v34  ;;  %959 = vmatpush.bf16.msra.mxu2 %v1691_v38  ;;  %v1814_v53 = vld [vmem:[%s2270_s30 + $0x1c8] sm:$0xf0]  ;;  %v1412_v55 = vld [vmem:[%s2270_s30 + $0x8c] sm:$0xf0]  ;;  %v1411_v57 = vor.u32 %v1774_v50, %v1410_v49  ;;  %v1827_v58 = vld [vmem:[%s2270_s30 + $0x234] sm:$0xf] }
  0x38   : > { %v1632_v59 = vld [vmem:[%s2270_s30 + $0x244] sm:$0xf0]  ;;  %v1571_v60 = vor.u32 %v1814_v53, %v1570_v51  ;;  %v1415_v61 = vor.u32 %v1772_v54, %v1412_v55  ;;  %v1390_v62 = vld [vmem:[%s2270_s30 + $0x50] sm:$0xf]  ;;  %v1769_v63 = vld [vmem:[%s2270_s30 + $0x60] sm:$0xf0] }
  0x39   : > { %930 = vmatpush.bf16.msra.mxu0 %v1431_v44  ;;  %v1550_v0 = vld [vmem:[%s2270_s30 + $0x190] sm:$0xf]  ;;  %v1809_v1 = vld [vmem:[%s2270_s30 + $0x1a0] sm:$0xf0]  ;;  %v1767_v2 = vld [vmem:[%s2270_s30 + $0x54] sm:$0xf]  ;;  %v1635_v4 = vor.u32 %v1827_v58, %v1632_v59  ;;  %v1391_v5 = vor.u32 %v1769_v63, %v1390_v62 }
  0x3a   : > { %943 = vmatpush.bf16.msra.mxu1 %v1591_v47  ;;  %v1392_v3 = vld [vmem:[%s2270_s30 + $0x64] sm:$0xf0]  ;;  %v1822_v6 = vld [vmem:[%s2270_s30 + $0x20c] sm:$0xf]  ;;  %v1612_v7 = vld [vmem:[%s2270_s30 + $0x21c] sm:$0xf0]  ;;  %v1551_v9 = vor.u32 %v1809_v1, %v1550_v0 }
  0x3b   : > { %969 = vmatpush.bf16.msra.mxu3 %v1435_v48  ;;  %960 = vmatpush.bf16.msra.mxu2 %v1671_v52  ;;  %v1370_v8 = vld [vmem:[%s2270_s30 + $0x28] sm:$0xf]  ;;  %v1395_v10 = vor.u32 %v1767_v2, %v1392_v3  ;;  %v1764_v11 = vld [vmem:[%s2270_s30 + $0x38] sm:$0xf0]  ;;  %v1762_v14 = vld [vmem:[%s2270_s30 + $0x2c] sm:$0xf]  ;;  %v1615_v17 = vor.u32 %v1822_v6, %v1612_v7 }
  0x3c   : > { %v1530_v12 = vld [vmem:[%s2270_s30 + $0x168] sm:$0xf]  ;;  %v1804_v13 = vld [vmem:[%s2270_s30 + $0x178] sm:$0xf0]  ;;  %v1372_v15 = vld [vmem:[%s2270_s30 + $0x3c] sm:$0xf0]  ;;  %v1371_v21 = vor.u32 %v1764_v11, %v1370_v8 }
  0x3d   : > { %931 = vmatpush.bf16.msra.mxu0 %v1411_v57  ;;  %v1817_v16 = vld [vmem:[%s2270_s30 + $0x1e4] sm:$0xf]  ;;  %v1592_v18 = vld [vmem:[%s2270_s30 + $0x1f4] sm:$0xf0]  ;;  %v1350_v19 = vld [vmem:[%s2270_s30] sm:$0xf]  ;;  %v1531_v26 = vor.u32 %v1804_v13, %v1530_v12  ;;  %v1375_v27 = vor.u32 %v1762_v14, %v1372_v15 }
  0x3e   : > { %944 = vmatpush.bf16.msra.mxu1 %v1571_v60  ;;  %v1759_v20 = vld [vmem:[%s2270_s30 + $0x10] sm:$0xf0]  ;;  %v1510_v22 = vld [vmem:[%s2270_s30 + $0x140] sm:$0xf]  ;;  %v1757_v24 = vld [vmem:[%s2270_s30 + $0x4] sm:$0xf]  ;;  %v1595_v34 = vor.u32 %v1817_v16, %v1592_v18 }
  0x3f   : > { %979 = vmatpush.bf16.msrb.mxu2 %v1655_v56  ;;  %970 = vmatpush.bf16.msra.mxu3 %v1415_v61  ;;  %v1799_v23 = vld [vmem:[%s2270_s30 + $0x150] sm:$0xf0]  ;;  %v2339_v25 = vld [vmem:[#allocation2] sm:$0x7]  ;;  %v1352_v28 = vld [vmem:[%s2270_s30 + $0x14] sm:$0xf0]  ;;  %v1351_v38 = vor.u32 %v1759_v20, %v1350_v19 }
  0x40   : > { %v1852_v29 = vld [vmem:[%s2270_s30 + $0x2fc] sm:$0xf]  ;;  %v276_v30 = vperm.slane %v2339_v25, 2  ;;  %v1732_v31 = vld [vmem:[%s2270_s30 + $0x30c] sm:$0xf0]  ;;  %v274_v41 = vperm.slane %v2339_v25, 0  ;;  %v1511_v42 = vor.u32 %v1799_v23, %v1510_v22  ;;  %v1355_v43 = vor.u32 %v1757_v24, %v1352_v28 }
  0x41   : > { %932 = vmatpush.bf16.msra.mxu0 %v1391_v5  ;;  %v1498_v32 = vld [vmem:[%s2270_s30 + $0x120] sm:$0xf]  ;;  %v1795_v33 = vld [vmem:[%s2270_s30 + $0x130] sm:$0xf0]  ;;  %v1812_v39 = vld [vmem:[%s2270_s30 + $0x1bc] sm:$0xf]  ;;  %v1735_v44 = vor.u32 %v1852_v29, %v1732_v31 }
  0x42   : > { %945 = vmatpush.bf16.msra.mxu1 %v1551_v9  ;;  %v1658_v35 = vld [vmem:[%s2270_s30 + $0x260] sm:$0xf]  ;;  %v1835_v36 = vld [vmem:[%s2270_s30 + $0x270] sm:$0xf0]  ;;  %v2349_v37 = vpack.c.bf16 %v276_v30, %v276_v30  ;;  %v1572_v40 = vld [vmem:[%s2270_s30 + $0x1cc] sm:$0xf0]  ;;  %v1499_v45 = vor.u32 %v1795_v33, %v1498_v32  ;;  %v2364_v56 = vpack.c.bf16 %v274_v41, %v274_v41 }
  0x43   : > { %980 = vmatpush.bf16.msrb.mxu2 %v1635_v4  ;;  %971 = vmatpush.bf16.msra.mxu3 %v1395_v10  ;;  %v1847_v46 = vld [vmem:[%s2270_s30 + $0x2d4] sm:$0xf]  ;;  %v1712_v47 = vld [vmem:[%s2270_s30 + $0x2e4] sm:$0xf0]  ;;  %v1659_v48 = vor.u32 %v1835_v36, %v1658_v35  ;;  %v1575_v49 = vor.u32 %v1812_v39, %v1572_v40  ;;  %v1478_v50 = vld [vmem:[%s2270_s30 + $0xf8] sm:$0xf] }
  0x44   : > { %1748 = vmatmul.msk.bf16.vlgmr.msra.gmra.mxu2 %vm923_vm0, %v2349_v37  ;;  %v1790_v51 = vld [vmem:[%s2270_s30 + $0x108] sm:$0xf0]  ;;  %v1638_v52 = vld [vmem:[%s2270_s30 + $0x238] sm:$0xf]  ;;  %v1807_v54 = vld [vmem:[%s2270_s30 + $0x194] sm:$0xf]  ;;  %v1715_v57 = vor.u32 %v1847_v46, %v1712_v47 }
  0x45   : > { %933 = vmatpush.bf16.msra.mxu0 %v1371_v21  ;;  %v1830_v53 = vld [vmem:[%s2270_s30 + $0x248] sm:$0xf0]  ;;  %v1552_v55 = vld [vmem:[%s2270_s30 + $0x1a4] sm:$0xf0]  ;;  %v1479_v58 = vor.u32 %v1790_v51, %v1478_v50  ;;  %v1692_v60 = vld [vmem:[%s2270_s30 + $0x2bc] sm:$0xf0] }
  0x46   : > { %946 = vmatpush.bf16.msra.mxu1 %v1531_v26  ;;  %v1842_v59 = vld [vmem:[%s2270_s30 + $0x2ac] sm:$0xf]  ;;  %v1458_v61 = vld [vmem:[%s2270_s30 + $0xd0] sm:$0xf]  ;;  %v1639_v62 = vor.u32 %v1830_v53, %v1638_v52  ;;  %v1555_v63 = vor.u32 %v1807_v54, %v1552_v55  ;;  %v1785_v0 = vld [vmem:[%s2270_s30 + $0xe0] sm:$0xf0] }
  0x47   : > { %981 = vmatpush.bf16.msrb.mxu2 %v1615_v17  ;;  %972 = vmatpush.bf16.msra.mxu3 %v1375_v27  ;;  %v1618_v1 = vld [vmem:[%s2270_s30 + $0x210] sm:$0xf]  ;;  %v1825_v2 = vld [vmem:[%s2270_s30 + $0x220] sm:$0xf0]  ;;  %v1802_v3 = vld [vmem:[%s2270_s30 + $0x16c] sm:$0xf]  ;;  %v1695_v6 = vor.u32 %v1842_v59, %v1692_v60  ;;  %v1459_v7 = vor.u32 %v1785_v0, %v1458_v61 }
  0x48   : > { %v1532_v4 = vld [vmem:[%s2270_s30 + $0x17c] sm:$0xf0]  ;;  %v275_v5 = vperm.slane %v2339_v25, 1  ;;  %v1837_v8 = vld [vmem:[%s2270_s30 + $0x284] sm:$0xf]  ;;  %v1619_v12 = vor.u32 %v1825_v2, %v1618_v1  ;;  %vm1135_vm1 = vcmask 1040384  }
  0x49   : > { %934 = vmatpush.bf16.msra.mxu0 %v1351_v38  ;;  %v1672_v9 = vld [vmem:[%s2270_s30 + $0x294] sm:$0xf0]  ;;  %v1438_v10 = vld [vmem:[%s2270_s30 + $0xa8] sm:$0xf]  ;;  %v1535_v13 = vor.u32 %v1802_v3, %v1532_v4  ;;  %v1780_v14 = vld [vmem:[%s2270_s30 + $0xb8] sm:$0xf0] }
  0x4a   : > { %947 = vmatpush.bf16.msra.mxu1 %v1511_v42  ;;  %v2380_v11 = vpack.c.bf16 %v275_v5, %v275_v5  ;;  %v1598_v15 = vld [vmem:[%s2270_s30 + $0x1e8] sm:$0xf]  ;;  %v1820_v16 = vld [vmem:[%s2270_s30 + $0x1f8] sm:$0xf0]  ;;  %v1797_v17 = vld [vmem:[%s2270_s30 + $0x144] sm:$0xf]  ;;  %v1675_v23 = vor.u32 %v1837_v8, %v1672_v9  ;;  %v1439_v24 = vor.u32 %v1780_v14, %v1438_v10 }
  0x4b   : > { %982 = vmatpush.bf16.msrb.mxu2 %v1595_v34  ;;  %973 = vmatpush.bf16.msra.mxu3 %v1355_v43  ;;  %v1512_v18 = vld [vmem:[%s2270_s30 + $0x154] sm:$0xf0]  ;;  %v1738_v19 = vld [vmem:[%s2270_s30 + $0x300] sm:$0xf]  ;;  %v1855_v20 = vld [vmem:[%s2270_s30 + $0x310] sm:$0xf0]  ;;  %v1599_v25 = vor.u32 %v1820_v16, %v1598_v15 }
  0x4c   : > { %935 = vmatmul.bf16.vlgmr.msra.gmra.mxu0 %v2364_v56  ;;  %v1793_v21 = vld [vmem:[%s2270_s30 + $0x124] sm:$0xf]  ;;  %v1500_v22 = vld [vmem:[%s2270_s30 + $0x134] sm:$0xf0]  ;;  %v1515_v26 = vor.u32 %v1797_v17, %v1512_v18  ;;  %v1418_v27 = vld [vmem:[%s2270_s30 + $0x80] sm:$0xf]  ;;  %v1739_v29 = vor.u32 %v1855_v20, %v1738_v19 }
  0x4d   : > { %996 = vmatpush.bf16.msrb.mxu0 %v1735_v44  ;;  %948 = vmatmul.bf16.vlgmr.msra.gmra.mxu1 %v2380_v11  ;;  %v1775_v28 = vld [vmem:[%s2270_s30 + $0x90] sm:$0xf0]  ;;  %v1503_v30 = vor.u32 %v1793_v21, %v1500_v22  ;;  %v1578_v31 = vld [vmem:[%s2270_s30 + $0x1c0] sm:$0xf]  ;;  %v1718_v33 = vld [vmem:[%s2270_s30 + $0x2d8] sm:$0xf] }
  0x4e   : > { %1005 = vmatpush.bf16.msrb.mxu1 %v1499_v45  ;;  %974 = vmatmul.bf16.vlgmr.msra.gmra.mxu3 %v2364_v56  ;;  %v1815_v32 = vld [vmem:[%s2270_s30 + $0x1d0] sm:$0xf0]  ;;  %v1850_v34 = vld [vmem:[%s2270_s30 + $0x2e8] sm:$0xf0]  ;;  %v1788_v35 = vld [vmem:[%s2270_s30 + $0xfc] sm:$0xf]  ;;  %v1419_v38 = vor.u32 %v1775_v28, %v1418_v27 }
  0x4f   : > { %1018 = vmatpush.bf16.msrb.mxu3 %v1659_v48  ;;  %983 = vmatpush.bf16.msrb.mxu2 %v1575_v49  ;;  %v1480_v36 = vld [vmem:[%s2270_s30 + $0x10c] sm:$0xf0]  ;;  %v1579_v39 = vor.u32 %v1815_v32, %v1578_v31  ;;  %v1398_v40 = vld [vmem:[%s2270_s30 + $0x58] sm:$0xf]  ;;  %v1770_v41 = vld [vmem:[%s2270_s30 + $0x68] sm:$0xf0]  ;;  %v1719_v42 = vor.u32 %v1850_v34, %v1718_v33 }
  0x50   : > { %v1483_v43 = vor.u32 %v1788_v35, %v1480_v36  ;;  %v1558_v44 = vld [vmem:[%s2270_s30 + $0x198] sm:$0xf]  ;;  %v1810_v45 = vld [vmem:[%s2270_s30 + $0x1a8] sm:$0xf0]  ;;  %v1698_v46 = vld [vmem:[%s2270_s30 + $0x2b0] sm:$0xf]  ;;  %v1399_v50 = vor.u32 %v1770_v41, %v1398_v40 }
  0x51   : > { %997 = vmatpush.bf16.msrb.mxu0 %v1715_v57  ;;  %v1845_v47 = vld [vmem:[%s2270_s30 + $0x2c0] sm:$0xf0]  ;;  %v1783_v48 = vld [vmem:[%s2270_s30 + $0xd4] sm:$0xf]  ;;  %v1460_v49 = vld [vmem:[%s2270_s30 + $0xe4] sm:$0xf0]  ;;  %v1559_v51 = vor.u32 %v1810_v45, %v1558_v44 }
  0x52   : > { %1006 = vmatpush.bf16.msrb.mxu1 %v1479_v58  ;;  %v1378_v52 = vld [vmem:[%s2270_s30 + $0x30] sm:$0xf]  ;;  %v1765_v53 = vld [vmem:[%s2270_s30 + $0x40] sm:$0xf0]  ;;  %v1699_v54 = vor.u32 %v1845_v47, %v1698_v46  ;;  %v1463_v55 = vor.u32 %v1783_v48, %v1460_v49  ;;  %v1678_v59 = vld [vmem:[%s2270_s30 + $0x288] sm:$0xf] }
  0x53   : > { %1019 = vmatpush.bf16.msrb.mxu3 %v1639_v62  ;;  %984 = vmatpush.bf16.msrb.mxu2 %v1555_v63  ;;  %v1538_v57 = vld [vmem:[%s2270_s30 + $0x170] sm:$0xf]  ;;  %v1805_v58 = vld [vmem:[%s2270_s30 + $0x180] sm:$0xf0]  ;;  %v1840_v60 = vld [vmem:[%s2270_s30 + $0x298] sm:$0xf0]  ;;  %v1379_v63 = vor.u32 %v1765_v53, %v1378_v52 }
  0x54   : > { %v1778_v61 = vld [vmem:[%s2270_s30 + $0xac] sm:$0xf]  ;;  %v1440_v62 = vld [vmem:[%s2270_s30 + $0xbc] sm:$0xf0]  ;;  %v1833_v0 = vld [vmem:[%s2270_s30 + $0x264] sm:$0xf]  ;;  %v1539_v3 = vor.u32 %v1805_v58, %v1538_v57 }
  0x55   : > { %998 = vmatpush.bf16.msrb.mxu0 %v1695_v6  ;;  %v1660_v1 = vld [vmem:[%s2270_s30 + $0x274] sm:$0xf0]  ;;  %v1358_v2 = vld [vmem:[%s2270_s30 + $0x8] sm:$0xf]  ;;  %v1760_v4 = vld [vmem:[%s2270_s30 + $0x18] sm:$0xf0]  ;;  %v1443_v8 = vor.u32 %v1778_v61, %v1440_v62 }
  0x56   : > { %1007 = vmatpush.bf16.msrb.mxu1 %v1459_v7  ;;  %v1518_v5 = vld [vmem:[%s2270_s30 + $0x148] sm:$0xf]  ;;  %v1800_v6 = vld [vmem:[%s2270_s30 + $0x158] sm:$0xf0]  ;;  %v1679_v7 = vor.u32 %v1840_v60, %v1678_v59  ;;  %v1853_v9 = vld [vmem:[%s2270_s30 + $0x304] sm:$0xf]  ;;  %v1359_v17 = vor.u32 %v1760_v4, %v1358_v2 }
  0x57   : > { %1020 = vmatpush.bf16.msrb.mxu3 %v1619_v12  ;;  %985 = vmatpush.bf16.msrb.mxu2 %v1535_v13  ;;  %v1740_v10 = vld [vmem:[%s2270_s30 + $0x314] sm:$0xf0]  ;;  %v1506_v12 = vld [vmem:[%s2270_s30 + $0x128] sm:$0xf]  ;;  %v1663_v13 = vor.u32 %v1833_v0, %v1660_v1  ;;  %v1796_v14 = vld [vmem:[%s2270_s30 + $0x138] sm:$0xf0]  ;;  %v1519_v20 = vor.u32 %v1800_v6, %v1518_v5 }
  0x58   : > { %v1773_v15 = vld [vmem:[%s2270_s30 + $0x84] sm:$0xf]  ;;  %v1420_v16 = vld [vmem:[%s2270_s30 + $0x94] sm:$0xf0]  ;;  %v1828_v18 = vld [vmem:[%s2270_s30 + $0x23c] sm:$0xf]  ;;  %v1743_v21 = vor.u32 %v1853_v9, %v1740_v10  ;;  %v1507_v22 = vor.u32 %v1796_v14, %v1506_v12 }
  0x59   : > { %999 = vmatpush.bf16.msrb.mxu0 %v1675_v23  ;;  %v1640_v19 = vld [vmem:[%s2270_s30 + $0x24c] sm:$0xf0]  ;;  %v1423_v23 = vor.u32 %v1773_v15, %v1420_v16  ;;  %v1791_v28 = vld [vmem:[%s2270_s30 + $0x110] sm:$0xf0]  ;;  %v1620_v32 = vld [vmem:[%s2270_s30 + $0x224] sm:$0xf0] }
  0x5a   : > { %1008 = vmatpush.bf16.msrb.mxu1 %v1439_v24  ;;  %v1848_v24 = vld [vmem:[%s2270_s30 + $0x2dc] sm:$0xf]  ;;  %v1643_v27 = vor.u32 %v1828_v18, %v1640_v19  ;;  %v1823_v31 = vld [vmem:[%s2270_s30 + $0x214] sm:$0xf]  ;;  %v1786_v41 = vld [vmem:[%s2270_s30 + $0xe8] sm:$0xf0] }
  0x5b   : > { %1021 = vmatpush.bf16.msrb.mxu3 %v1599_v25  ;;  %986 = vmatpush.bf16.msrb.mxu2 %v1515_v26  ;;  %v1720_v25 = vld [vmem:[%s2270_s30 + $0x2ec] sm:$0xf0]  ;;  %v1486_v26 = vld [vmem:[%s2270_s30 + $0x100] sm:$0xf]  ;;  %v1843_v36 = vld [vmem:[%s2270_s30 + $0x2b4] sm:$0xf]  ;;  %v1623_v40 = vor.u32 %v1823_v31, %v1620_v32 }
  0x5c   : > { %1749 = vmatmul.msk.bf16.vlgmr.msrb.gmra.mxu0 %vm923_vm0, %v2349_v37  ;;  %v1723_v33 = vor.u32 %v1848_v24, %v1720_v25  ;;  %v1487_v34 = vor.u32 %v1791_v28, %v1486_v26  ;;  %v1818_v44 = vld [vmem:[%s2270_s30 + $0x1ec] sm:$0xf]  ;;  %v1600_v45 = vld [vmem:[%s2270_s30 + $0x1fc] sm:$0xf0]  ;;  %v1781_v52 = vld [vmem:[%s2270_s30 + $0xc0] sm:$0xf0] }
  0x5d   : > { %1035 = vmatpush.bf16.msra.mxu0 %v1739_v29  ;;  %v1768_v29 = vld [vmem:[%s2270_s30 + $0x5c] sm:$0xf]  ;;  %v1838_v47 = vld [vmem:[%s2270_s30 + $0x28c] sm:$0xf]  ;;  %v1603_v53 = vor.u32 %v1818_v44, %v1600_v45  ;;  %v1813_v57 = vld [vmem:[%s2270_s30 + $0x1c4] sm:$0xf] }
  0x5e   : > { %1009 = vmatpush.bf16.msrb.mxu1 %v1419_v38  ;;  %987 = vmatmul.bf16.vlgmr.msrb.gmra.mxu2 %v2380_v11  ;;  %v1700_v38 = vld [vmem:[%s2270_s30 + $0x2c4] sm:$0xf0]  ;;  %v1580_v58 = vld [vmem:[%s2270_s30 + $0x1d4] sm:$0xf0]  ;;  %v1836_v60 = vld [vmem:[%s2270_s30 + $0x278] sm:$0xf0] }
  0x5f   : > { %1044 = vmatpush.bf16.msra.mxu2 %v1503_v30  ;;  %1022 = vmatpush.bf16.msrb.mxu3 %v1579_v39  ;;  %v1400_v30 = vld [vmem:[%s2270_s30 + $0x6c] sm:$0xf0]  ;;  %v1466_v39 = vld [vmem:[%s2270_s30 + $0xd8] sm:$0xf]  ;;  %v1703_v46 = vor.u32 %v1843_v36, %v1700_v38  ;;  %v1666_v59 = vld [vmem:[%s2270_s30 + $0x268] sm:$0xf]  ;;  %v1583_v2 = vor.u32 %v1813_v57, %v1580_v58 }
  0x60   : > { %v1403_v35 = vor.u32 %v1768_v29, %v1400_v30  ;;  %v1467_v48 = vor.u32 %v1786_v41, %v1466_v39  ;;  %v1746_v62 = vld [vmem:[%s2270_s30 + $0x308] sm:$0xf]  ;;  %v1776_v5 = vld [vmem:[%s2270_s30 + $0x98] sm:$0xf0]  ;;  %v1831_v9 = vld [vmem:[%s2270_s30 + $0x250] sm:$0xf0] }
  0x61   : > { %1036 = vmatpush.bf16.msra.mxu0 %v1719_v42  ;;  %v1763_v42 = vld [vmem:[%s2270_s30 + $0x34] sm:$0xf]  ;;  %v1426_v4 = vld [vmem:[%s2270_s30 + $0x88] sm:$0xf]  ;;  %v1808_v6 = vld [vmem:[%s2270_s30 + $0x19c] sm:$0xf] }
  0x62   : > { %1010 = vmatpush.bf16.msrb.mxu1 %v1399_v50  ;;  %v1680_v50 = vld [vmem:[%s2270_s30 + $0x29c] sm:$0xf0]  ;;  %v1427_v14 = vor.u32 %v1776_v5, %v1426_v4  ;;  %v1771_v18 = vld [vmem:[%s2270_s30 + $0x70] sm:$0xf0]  ;;  %v1706_v24 = vld [vmem:[%s2270_s30 + $0x2b8] sm:$0xf] }
  0x63   : > { %1045 = vmatpush.bf16.msra.mxu2 %v1483_v43  ;;  %1023 = vmatpush.bf16.msrb.mxu3 %v1559_v51  ;;  %v1380_v43 = vld [vmem:[%s2270_s30 + $0x44] sm:$0xf0]  ;;  %v1446_v51 = vld [vmem:[%s2270_s30 + $0xb0] sm:$0xf]  ;;  %v1683_v61 = vor.u32 %v1838_v47, %v1680_v50  ;;  %v1726_v12 = vld [vmem:[%s2270_s30 + $0x2e0] sm:$0xf] }
  0x64   : > { %v1383_v49 = vor.u32 %v1763_v42, %v1380_v43  ;;  %v1447_v0 = vor.u32 %v1781_v52, %v1446_v51  ;;  %v1803_v19 = vld [vmem:[%s2270_s30 + $0x174] sm:$0xf]  ;;  %v1846_v25 = vld [vmem:[%s2270_s30 + $0x2c8] sm:$0xf0]  ;;  %v1386_v29 = vld [vmem:[%s2270_s30 + $0x38] sm:$0xf] }
  0x65   : > { %1037 = vmatpush.bf16.msra.mxu0 %v1699_v54  ;;  %v1758_v54 = vld [vmem:[%s2270_s30 + $0xc] sm:$0xf]  ;;  %v1520_v32 = vld [vmem:[%s2270_s30 + $0x15c] sm:$0xf0]  ;;  %v1686_v36 = vld [vmem:[%s2270_s30 + $0x290] sm:$0xf] }
  0x66   : > { %1011 = vmatpush.bf16.msrb.mxu1 %v1379_v63  ;;  %v1856_v63 = vld [vmem:[%s2270_s30 + $0x318] sm:$0xf0]  ;;  %v1766_v30 = vld [vmem:[%s2270_s30 + $0x48] sm:$0xf0]  ;;  %v1841_v38 = vld [vmem:[%s2270_s30 + $0x2a0] sm:$0xf0] }
  0x67   : > { %1046 = vmatpush.bf16.msra.mxu2 %v1463_v55  ;;  %1024 = vmatpush.bf16.msrb.mxu3 %v1539_v3  ;;  %v1360_v55 = vld [vmem:[%s2270_s30 + $0x1c] sm:$0xf0]  ;;  %v1667_v3 = vor.u32 %v1836_v60, %v1666_v59  ;;  %v1747_v10 = vor.u32 %v1856_v63, %v1746_v62  ;;  %v1798_v31 = vld [vmem:[%s2270_s30 + $0x14c] sm:$0xf]  ;;  %v1387_v39 = vor.u32 %v1766_v30, %v1386_v29  ;;  %v1366_v42 = vld [vmem:[%s2270_s30 + $0x10] sm:$0xf] }
  0x68   : > { %v1363_v1 = vor.u32 %v1758_v54, %v1360_v55  ;;  %v1761_v43 = vld [vmem:[%s2270_s30 + $0x20] sm:$0xf0]  ;;  %v1586_v44 = vld [vmem:[%s2270_s30 + $0x1c8] sm:$0xf]  ;;  %v1816_v45 = vld [vmem:[%s2270_s30 + $0x1d8] sm:$0xf0] }
  0x69   : > { %1038 = vmatpush.bf16.msra.mxu0 %v1679_v7  ;;  %v1560_v7 = vld [vmem:[%s2270_s30 + $0x1ac] sm:$0xf0]  ;;  %v1367_v47 = vor.u32 %v1761_v43, %v1366_v42  ;;  %v1811_v50 = vld [vmem:[%s2270_s30 + $0x1b0] sm:$0xf0]  ;;  %v1546_v52 = vld [vmem:[%s2270_s30 + $0x178] sm:$0xf] }
  0x6a   : > { %1012 = vmatpush.bf16.msrb.mxu1 %v1359_v17  ;;  %v1563_v15 = vor.u32 %v1808_v6, %v1560_v7  ;;  %v1406_v17 = vld [vmem:[%s2270_s30 + $0x60] sm:$0xf]  ;;  %v1526_v55 = vld [vmem:[%s2270_s30 + $0x150] sm:$0xf]  ;;  %v1801_v57 = vld [vmem:[%s2270_s30 + $0x160] sm:$0xf0] }
  0x6b   : > { %1047 = vmatpush.bf16.msra.mxu2 %v1443_v8  ;;  %1025 = vmatpush.bf16.msrb.mxu3 %v1519_v20  ;;  %v1646_v8 = vld [vmem:[%s2270_s30 + $0x240] sm:$0xf]  ;;  %v1540_v20 = vld [vmem:[%s2270_s30 + $0x184] sm:$0xf0]  ;;  %v1407_v26 = vor.u32 %v1771_v18, %v1406_v17  ;;  %v1527_v58 = vor.u32 %v1801_v57, %v1526_v55  ;;  %s1860_s6 = smul.u32 5, %s2267_s28  ;;  %vm1137_vm2 = vcmask 1041408  }
  0x6c   : > { %1750 = vmatmul.msk.bf16.vlgmr.msra.gmra.mxu0 %vm923_vm0, %v2349_v37  ;;  %v1647_v16 = vor.u32 %v1831_v9, %v1646_v8  ;;  %vm1139_vm3 = vcmask 1043459   ;;  %vm1141_vm4 = vcmask 1042432   ;;  %s1217_s27 = smul.u32 5, %s2114_s15  ;;  %s1210_s15 = scalar_lea.sflag [#allocation4], %s2267_s28 }
  0x6d   : > { %1057 = vmatpush.bf16.msrb.mxu0 %v1663_v13  ;;  %1013 = vmatmul.bf16.vlgmr.msrb.gmra.mxu1 %v2364_v56  ;;  %v1851_v13 = vld [vmem:[%s2270_s30 + $0x2f0] sm:$0xf0]  ;;  %s2512_s10 = scalar_lea.vmem [#allocation8], %s1860_s6  ;;  %s237_s19 = scalar_lea.vmem [#allocation7], %s1860_s6 }
  0x6e   : > { %1074 = vmatpush.bf16.msra.mxu1 %v1743_v21  ;;  %1026 = vmatmul.bf16.vlgmr.msrb.gmra.mxu3 %v2380_v11  ;;  %v1626_v21 = vld [vmem:[%s2270_s30 + $0x218] sm:$0xf]  ;;  %s1220_s7 = scalar_lea.hbm %s2563_s3, %s1217_s27  ;;  %s1222_s8 = sshll.u32 %s2512_s10, 4  ;;  %s1223_s8 = int_to_ptr.vmem [resolvable:$true] %s1222_s8 }
  0x6f   : > { %1083 = vmatpush.bf16.msra.mxu3 %v1507_v22  ;;  %1048 = vmatpush.bf16.msra.mxu2 %v1423_v23  ;;  %v1826_v22 = vld [vmem:[%s2270_s30 + $0x228] sm:$0xf0]  ;;  %v1727_v23 = vor.u32 %v1851_v13, %v1726_v12  ;;  %s1224_s9 = sshll.u32 %s1220_s7, 4  ;;  %s2056_s26 = scalar_lea.hbm %s2563_s3, 10  ;;  %s1225_s9 = int_to_ptr.hbm [resolvable:$true] %s1224_s9 }
  0x70   : > { %v1627_v28 = vor.u32 %v1826_v22, %v1626_v21  ;;  %s2050_s11 = sshra.s32 %s1225_s9, 4  ;;  %s2051_s11 = int_to_ptr.hbm [resolvable:$true] %s2050_s11 }
  0x71   : > { %1058 = vmatpush.bf16.msrb.mxu0 %v1643_v27  ;;  %v1543_v27 = vor.u32 %v1803_v19, %v1540_v20  ;;  %s2052_s23 = scalar_lea.hbm %s2051_s11, 5  ;;  %p2057_p10 = scmp.lt.s32.totalorder %s2051_s11, %s2563_s3 }
  0x72   : > { %1075 = vmatpush.bf16.msra.mxu1 %v1723_v33  ;;  %v1606_v33 = vld [vmem:[%s2270_s30 + $0x1f0] sm:$0xf]  ;;  %p2053_p7 = scmp.ne.s32.totalorder %s2051_s11, %s2052_s23  ;;  %p2058_p11 = scmp.lt.s32.totalorder %s2056_s26, %s2052_s23 }
  0x73   : > { %1084 = vmatpush.bf16.msra.mxu3 %v1487_v34  ;;  %1049 = vmatpush.bf16.msra.mxu2 %v1403_v35  ;;  %v1821_v34 = vld [vmem:[%s2270_s30 + $0x200] sm:$0xf0]  ;;  %v1707_v35 = vor.u32 %v1846_v25, %v1706_v24 }
  0x74   : > { %v1607_v41 = vor.u32 %v1821_v34, %v1606_v33  ;;  %v1144_v33 = vlaneseq  ;;  %p2054_p8 = pnand %p2053_p7, %p2230_p0  ;;  %p2059_p12 = por %p2058_p11, %p2057_p10 }
  0x75   : > { %1059 = vmatpush.bf16.msrb.mxu0 %v1623_v40  ;;  %v1523_v40 = vor.u32 %v1798_v31, %v1520_v32 }
  0x76   : > { %1076 = vmatpush.bf16.msra.mxu1 %v1703_v46  ;;  %v1687_v46 = vor.u32 %v1841_v38, %v1686_v36  ;;  %vm2508_vm5 = vcmp.lt.s32.totalorder %v1144_v33, 640  ;;  %p2055_p9 = pneg %p2054_p8 }
  0x77   : > { %1085 = vmatpush.bf16.msra.mxu3 %v1467_v48  ;;  %1050 = vmatpush.bf16.msra.mxu2 %v1383_v49  ;;  %v1587_v48 = vor.u32 %v1816_v45, %v1586_v44  ;;  %v1566_v49 = vld [vmem:[%s2270_s30 + $0x1a0] sm:$0xf] }
  0x78   : > { %v1567_v51 = vor.u32 %v1811_v50, %v1566_v49  ;;  %v1182_v44 = vld [vmem:[%s237_s19] sm:$0x1f]  ;;  %p2060_p13 = pnand %p2059_p12, %p2055_p9 }
  0x79   : > { %1060 = vmatpush.bf16.msrb.mxu0 %v1603_v53  ;;  %v1806_v53 = vld [vmem:[%s2270_s30 + $0x188] sm:$0xf0] }
  0x7a   : > { %1077 = vmatpush.bf16.msra.mxu1 %v1683_v61  ;;  %v1547_v54 = vor.u32 %v1806_v53, %v1546_v52 }
  0x7b   : > { %1086 = vmatpush.bf16.msra.mxu3 %v1447_v0  ;;  %1051 = vmatpush.bf16.msra.mxu2 %v1363_v1 }
  0x7d   : > { %1061 = vmatpush.bf16.msrb.mxu0 %v1583_v2  ;;  %1751 = vmatmul.msk.bf16.vlgmr.msra.gmra.mxu1 %vm923_vm0, %v2349_v37 }
  0x7e   : > { %1096 = vmatpush.bf16.msrb.mxu1 %v1667_v3  ;;  %1052 = vmatmul.bf16.vlgmr.msra.gmra.mxu2 %v2364_v56 }
  0x7f   : > { %1113 = vmatpush.bf16.msrb.mxu2 %v1747_v10  ;;  %1087 = vmatpush.bf16.msra.mxu3 %v1427_v14 }
  0x81   : > { %1062 = vmatpush.bf16.msrb.mxu0 %v1563_v15 }
  0x82   : > { %1097 = vmatpush.bf16.msrb.mxu1 %v1647_v16 }
  0x83   : > { %1114 = vmatpush.bf16.msrb.mxu2 %v1727_v23  ;;  %1088 = vmatpush.bf16.msra.mxu3 %v1407_v26 }
  0x85   : > { %1063 = vmatpush.bf16.msrb.mxu0 %v1543_v27 }
  0x86   : > { %1098 = vmatpush.bf16.msrb.mxu1 %v1627_v28 }
  0x87   : > { %1115 = vmatpush.bf16.msrb.mxu2 %v1707_v35  ;;  %1089 = vmatpush.bf16.msra.mxu3 %v1387_v39 }
  0x89   : > { %1064 = vmatpush.bf16.msrb.mxu0 %v1523_v40 }
  0x8a   : > { %1099 = vmatpush.bf16.msrb.mxu1 %v1607_v41 }
  0x8b   : > { %1116 = vmatpush.bf16.msrb.mxu2 %v1687_v46  ;;  %1090 = vmatpush.bf16.msra.mxu3 %v1367_v47 }
  0x8c   : > { %1065 = vmatmul.bf16.vlgmr.msrb.gmra.mxu0 %v2380_v11 }
  0x8e   : > { %1100 = vmatpush.bf16.msrb.mxu1 %v1587_v48  ;;  %1091 = vmatmul.bf16.vlgmr.msra.gmra.mxu3 %v2364_v56 }
  0x8f   : > { %1752 = vmatmul.msk.bf16.vlgmr.msrb.gmra.mxu2 %vm923_vm0, %v2349_v37 }
  0x92   : > { %1101 = vmatpush.bf16.msrb.mxu1 %v1567_v51 }
  0x96   : > { %1102 = vmatpush.bf16.msrb.mxu1 %v1547_v54 }
  0x9a   : > { %1103 = vmatpush.bf16.msrb.mxu1 %v1527_v58 }
  0x9d   : > { %1104 = vmatmul.bf16.vlgmr.msrb.gmra.mxu1 %v2380_v11 }
  0xc7   : > { %v962_v60 = vpop.f32.mrf.mxu2 }
  0xc9   : > { %v936_v59 = vpop.f32.mrf.mxu0 }
  0xca   : > { %v949_v61 = vpop.f32.mrf.mxu1 }
  0xcb   : > { %v950_v62 = vadd.f32 %v949_v61, %v936_v59 }
  0xcd   : > { %v963_v0 = vadd.f32 %v962_v60, %v950_v62 }
  0xcf   : > { %v964_v56 = vpop.f32.mrf.mxu2 }
  0xd1   : > { %v975_v63 = vpop.f32.mrf.mxu3  ;;  %v938_v1 = vpop.f32.mrf.mxu0 }
  0xd2   : > { %v951_v2 = vpop.f32.mrf.mxu1 }
  0xd9   : > { %v977_v3 = vpop.f32.mrf.mxu3  ;;  %v1001_v37 = vpop.f32.mrf.mxu0 }
  0xe1   : > { %v988_v4 = vpop.f32.mrf.mxu2  ;;  %v1003_v8 = vpop.f32.mrf.mxu0 }
  0xe2   : > { %v989_v5 = vadd.f32 %v988_v4, %v975_v63 }
  0xe4   : > { %v1002_v6 = vadd.f32 %v1001_v37, %v989_v5 }
  0xe6   : > { %v1131_v7 = vrot.slane %v1002_v6, 7 }
  0xe8   : > { %v1136_v9 = vsel %vm1135_vm1, %v963_v0, %v1131_v7 }
  0xe9   : > { %v990_v10 = vpop.f32.mrf.mxu2  ;;  %v1040_v12 = vpop.f32.mrf.mxu0 }
  0xea   : > { %v1014_v11 = vpop.f32.mrf.mxu1 }
  0xf1   : > { %v1027_v13 = vpop.f32.mrf.mxu3  ;;  %v1042_v15 = vpop.f32.mrf.mxu0 }
  0xf2   : > { %v1016_v14 = vpop.f32.mrf.mxu1  ;;  %v1028_v25 = vadd.f32 %v1027_v13, %v1014_v11 }
  0xf4   : > { %v1041_v27 = vadd.f32 %v1040_v12, %v1028_v25 }
  0xf6   : > { %v1132_v34 = vrot.slane %v1041_v27, 6 }
  0xf8   : > { %v1138_v40 = vsel %vm1137_vm2, %v1136_v9, %v1132_v34 }
  0xf9   : > { %v1029_v16 = vpop.f32.mrf.mxu3 }
  0xfa   : > { %v1079_v17 = vpop.f32.mrf.mxu1 }
 0x101   : > { %v1053_v18 = vpop.f32.mrf.mxu2 }
 0x102   : > { %v1081_v19 = vpop.f32.mrf.mxu1 }
 0x109   : > { %v1066_v20 = vpop.f32.mrf.mxu0  ;;  %v1055_v21 = vpop.f32.mrf.mxu2 }
 0x10a   : > { %v1067_v26 = vadd.f32 %v1066_v20, %v1053_v18 }
 0x10c   : > { %v1080_v29 = vadd.f32 %v1079_v17, %v1067_v26 }
 0x10e   : > { %v1133_v36 = vrot.slane %v1080_v29, 5 }
 0x111   : > { %v1068_v22 = vpop.f32.mrf.mxu0  ;;  %v1092_v23 = vpop.f32.mrf.mxu3 }
 0x112   : > { %v1118_v24 = vpop.f32.mrf.mxu2 }
 0x119   : > { %v1094_v31 = vpop.f32.mrf.mxu3 }
 0x11a   : > { %v1105_v28 = vpop.f32.mrf.mxu1  ;;  %v1120_v32 = vpop.f32.mrf.mxu2 }
 0x11b   : > { %v1106_v30 = vadd.f32 %v1105_v28, %v1092_v23 }
 0x11d   : > { %v1119_v35 = vadd.f32 %v1118_v24, %v1106_v30 }
 0x11f   : > { %v1134_v38 = vrot.slane %v1119_v35, 4 }
 0x121   : > { %v1140_v41 = vsel %vm1139_vm3, %v1133_v36, %v1134_v38 }
 0x122   : > { %v1142_v42 = vsel %vm1141_vm4, %v1138_v40, %v1140_v41  ;;  %v1107_v43 = vpop.f32.mrf.mxu1 }
 0x123   : > { %1148 = vst.msk [vmem:[%s2512_s10] sm:$0x1f] %vm2508_vm5, %v1142_v42 }
 0x12a   : > { %v1181_v45 = vld [vmem:[%s2512_s10] sm:$0x1f] }
 0x12b   : > { %v1183_v46 = vadd.f32 %v1182_v44, %v1181_v45 }
 0x12d   : > { %v1753_v47 = vmul.f32 -1.442695, %v1183_v46 }
 0x12f   : > { %1942 = vpow2.f32 %v1753_v47 }
 0x135   : > { %v1943_v48 = vpop.eup %1942 }
 0x136   : > { %v1187_v49 = vadd.f32 1.0, %v1943_v48 }
 0x138   : > { %1944 = vrcp.f32 %v1187_v49  ;;  %v1199_v53 = vand.u32 2147483648, %v1187_v49  ;;  %v1197_v55 = vand.u32 2147483647, %v1187_v49  ;;  %vm1193_vm7 = vweird.f32 %v1187_v49 }
 0x13a   : > { %v1200_v58 = vor.u32 1.1754944e-38, %v1199_v53  ;;  %vm1198_vm9 = vcmp.eq.f32.partialorder %v1197_v55, 8.507059e+37 }
 0x13e   : > { %v1945_v50 = vpop.eup %1944 }
 0x13f   : > { %v1189_v51 = vmul.f32 %v1945_v50, %v1187_v49  ;;  %vm1194_vm6 = vweird.f32 %v1945_v50 }
 0x140   : > { %vm1195_vm8 = vmor %vm1193_vm7, %vm1194_vm6 }
 0x141   : > { %v1190_v52 = vsub.f32 1.0, %v1189_v51 }
 0x143   : > { %v1191_v54 = vmul.f32 %v1945_v50, %v1190_v52 }
 0x145   : > { %v1192_v57 = vadd.f32 %v1945_v50, %v1191_v54 }
 0x147   : > { %v1196_v59 = vsel %vm1195_vm8, %v1945_v50, %v1192_v57 }
 0x148   : > { %v1201_v60 = vsel %vm1198_vm9, %v1200_v58, %v1196_v59 }
 0x149   : > { %v1203_v61 = vmul.f32 %v1201_v60, %v1183_v46 }
 0x14b   : > { %1208 = vst.msk [vmem:[%s2512_s10] sm:$0x1f] %vm2508_vm5, %v1203_v61 }
 0x14c   : > { %2063 = shalt.err (!%p2060_p13)
}
 0x14d   : > { %1869 = dma.vmem_to_hbm [thread:$0]  (%p2230_p0), %s1223_s8, 80, %s1225_s9, %s1210_s15  }
 0x14e PF: > { %s1236_s28 = sand.u32 1, %s2102_s12   ;;  %p1883_p4 = pnand %p1344_p3, %p2234_p2 }
 0x14f   : > { %s1237_s6 = scalar_lea.sflag [#allocation4], %s1236_s28 }
 0x150   : > { %p1884_p5 = pneg %p1883_p4 }
 0x152   : > { %2097 = dma.done.wait (%p1884_p5), %s1237_s6, 80  }
 0x153   : > { %2099 = vsyncadd (%p1884_p5), %s1237_s6, 4294967216  ;;  %s20_s17 = sadd.s32 1, %s2122_s17   ;;  %s2571_s12 = smov %s2106_s13 }
 0x154   : > { %p17_p1 = scmp.ge.s32.totalorder %s20_s17, 4   ;;  %s2572_s13 = smov %s2110_s14 }
 0x155   : > { %s2573_s14 = smov %s2196_s24  ;;  %s2574_s15 = smov %s2118_s16 }
 0x156   : > { %s2575_s16 = smov %s2577_s18  ;;  %19 = sbr.rel (!%p17_p1) target bundleno = 7 (0x7), region = 106 }
 0x15b   :  { %1243 = vsyncpa [#allocation3], 1 }
 0x15c   :  { %1245 = vsyncpa [#allocation3 + $0x1], 1 }
 0x15d   :  { %1246 = vsyncpa [#allocation6], 1 }
 0x15e   :  { %1248 = vsyncpa [#allocation6 + $0x1], 1 }
 0x15f   :  { %1249 = vsyncpa [#allocation4], 1 }
 0x160   :  { %1251 = vsyncpa [#allocation4 + $0x1], 1 }

</bundles_post_ra>
